<compile_context>
chip_gen: v7x
topology: tpu7x:2x2x1
jax: 0.10.0
libtpu: 0.0.40
codegen_flags: <defaults>
</compile_context>

<pallas_src>
import jax
import jax.numpy as jnp
from jax.experimental import pallas as pl
from jax.experimental.pallas import tpu as pltpu


def _gather_sum_kernel(ids_ref, wsum_ref, out_ref):
    """Gather rows of the pre-summed embedding table for one tile of tokens.

    ids_ref : SMEM (n_pad,) int32   -- ALL token ids (scalar-prefetched)
    wsum_ref: VMEM (V, Dp) float32  -- W_vector + W_position, lane-padded
    out_ref : VMEM (TM, Dp) float32 -- gathered embeddings for this tile
    """
    tm = out_ref.shape[0]
    vocab = wsum_ref.shape[0]
    base = pl.program_id(0) * tm

    def body(t, carry):
        row = ids_ref[base + t]
        # Guard out-of-range ids: VMEM reads have no hardware bounds check.
        row = jnp.clip(row, 0, vocab - 1)
        out_ref[pl.ds(t, 1), :] = wsum_ref[pl.ds(row, 1), :]
        return carry

    jax.lax.fori_loop(0, tm, body, 0, unroll=True)


def text_forward(x_ids, w_vector, w_position, *, tm=None):
    """Pallas implementation of text.forward(x) = Emb_vec(x) + Emb_pos(x)."""
    length, text_dim = x_ids.shape
    vocab, dim = w_vector.shape
    n = length * text_dim

    # Fold both tables once (same ids index both) -> a single gather.
    w_sum = (w_vector + w_position).astype(jnp.float32)

    # Lane-dense output: pad the embedding dim up to a multiple of 128.
    dim_pad = pl.cdiv(dim, 128) * 128
    if dim_pad != dim:
        w_sum = jnp.pad(w_sum, ((0, 0), (0, dim_pad - dim)))

    # Single grid step by default (sublane-aligned token count). Pass tm
    # explicitly (e.g. 128/256) only when length*text grows large.
    if tm is None:
        tm = max(8, pl.cdiv(n, 8) * 8)
    n_pad = pl.cdiv(n, tm) * tm

    ids_flat = jnp.pad(x_ids.reshape(n).astype(jnp.int32), (0, n_pad - n))

    out_flat = pl.pallas_call(
        _gather_sum_kernel,
        out_shape=jax.ShapeDtypeStruct((n_pad, dim_pad), jnp.float32),
        grid_spec=pltpu.PrefetchScalarGridSpec(
            num_scalar_prefetch=1,                       # ids -> SMEM
            grid=(n_pad // tm,),
            in_specs=[
                # Full summed table resident in VMEM (tiny at vocab=16;
                # switch to memory_space=pl.ANY + DMA gather if vocab grows
                # to multi-MiB scale, esp. on v7x's 64 MiB VMEM).
                pl.BlockSpec((vocab, dim_pad), lambda i, ids: (0, 0)),
            ],
            out_specs=pl.BlockSpec((tm, dim_pad), lambda i, ids: (i, 0)),
        ),
    )(ids_flat, w_sum)

    return out_flat[:n, :dim].reshape(length, text_dim, dim)


if __name__ == "__main__":
    # Small, deterministic setup consistent with the module:
    # vocabulary.size = 16, embedding dim = 300, x is (length, text) token ids.
    vocab_size = 16
    embed_dim = 300
    length, text_dim = 8, 4

    key = jax.random.PRNGKey(0)
    k_vec, k_pos, k_ids = jax.random.split(key, 3)

    # nn.Embedding default init ~ N(0, 1)
    w_vector = jax.random.normal(k_vec, (vocab_size, embed_dim), dtype=jnp.float32)
    w_position = jax.random.normal(k_pos, (vocab_size, embed_dim), dtype=jnp.float32)

    x = jax.random.randint(k_ids, (length, text_dim), 0, vocab_size, dtype=jnp.int32)

    y = text_forward(x, w_vector, w_position)
    y = jax.block_until_ready(y)

    # Reference check (plain JAX gather) — semantics must match exactly.
    y_ref = w_vector[x] + w_position[x]
    assert y.shape == (length, text_dim, embed_dim)
    assert jnp.allclose(y, y_ref, atol=1e-5), "mismatch vs reference gather"

    print("KERNEL_OK")
</pallas_src>

<mosaic_0001>
module attributes {stable_mosaic.version = 11 : i64} {
  func.func @_gather_sum_kernel(%arg0: i32, %arg1: memref<32xi32, #tpu.memory_space<smem>>, %arg2: memref<16x384xf32, #tpu.memory_space<vmem>>, %arg3: memref<32x384xf32, #tpu.memory_space<vmem>>) attributes {dimension_semantics = [#tpu.dimension_semantics<arbitrary>], iteration_bounds = array<i64: 1>, scalar_prefetch = 1 : i64, scratch_operands = 0 : i64, tpu.core_type = #tpu.core_type<tc>, window_params = [{pipeline_mode = #tpu.pipeline_mode<synchronous>, transform_indices = @transform_0, window_bounds = array<i64: 16, 384>}, {transform_indices = @transform_1, window_bounds = array<i64: 32, 384>}]} {
    %c32_i32 = arith.constant 32 : i32
    %0 = arith.muli %arg0, %c32_i32 : i32
    %c0_i32 = arith.constant 0 : i32
    %1 = arith.addi %0, %c0_i32 : i32
    %2 = arith.index_cast %1 : i32 to index
    %3 = memref.load %arg1[%2] : memref<32xi32, #tpu.memory_space<smem>>
    %c0_i32_0 = arith.constant 0 : i32
    %c15_i32 = arith.constant 15 : i32
    %4 = arith.maxsi %c0_i32_0, %3 : i32
    %5 = arith.minsi %c15_i32, %4 : i32
    %6 = arith.index_cast %5 : i32 to index
    %c0 = arith.constant 0 : index
    %7 = vector.load %arg2[%6, %c0] : memref<16x384xf32, #tpu.memory_space<vmem>>, vector<1x384xf32>
    %8 = arith.index_cast %c0_i32 : i32 to index
    %c0_1 = arith.constant 0 : index
    %9 = vector.load %arg3[%8, %c0_1] : memref<32x384xf32, #tpu.memory_space<vmem>>, vector<1x384xf32>
    tpu.vector_store %arg3[%8, %c0_1], %7 {strides = array<i32>} : memref<32x384xf32, #tpu.memory_space<vmem>>, vector<1x384xf32>,
    %c1_i32 = arith.constant 1 : i32
    %10 = arith.addi %0, %c1_i32 : i32
    %11 = arith.index_cast %10 : i32 to index
    %12 = memref.load %arg1[%11] : memref<32xi32, #tpu.memory_space<smem>>
    %c0_i32_2 = arith.constant 0 : i32
    %c15_i32_3 = arith.constant 15 : i32
    %13 = arith.maxsi %c0_i32_2, %12 : i32
    %14 = arith.minsi %c15_i32_3, %13 : i32
    %15 = arith.index_cast %14 : i32 to index
    %c0_4 = arith.constant 0 : index
    %16 = vector.load %arg2[%15, %c0_4] : memref<16x384xf32, #tpu.memory_space<vmem>>, vector<1x384xf32>
    %17 = arith.index_cast %c1_i32 : i32 to index
    %c0_5 = arith.constant 0 : index
    %18 = vector.load %arg3[%17, %c0_5] : memref<32x384xf32, #tpu.memory_space<vmem>>, vector<1x384xf32>
    tpu.vector_store %arg3[%17, %c0_5], %16 {strides = array<i32>} : memref<32x384xf32, #tpu.memory_space<vmem>>, vector<1x384xf32>,
    %c2_i32 = arith.constant 2 : i32
    %19 = arith.addi %0, %c2_i32 : i32
    %20 = arith.index_cast %19 : i32 to index
    %21 = memref.load %arg1[%20] : memref<32xi32, #tpu.memory_space<smem>>
    %c0_i32_6 = arith.constant 0 : i32
    %c15_i32_7 = arith.constant 15 : i32
    %22 = arith.maxsi %c0_i32_6, %21 : i32
    %23 = arith.minsi %c15_i32_7, %22 : i32
    %24 = arith.index_cast %23 : i32 to index
    %c0_8 = arith.constant 0 : index
    %25 = vector.load %arg2[%24, %c0_8] : memref<16x384xf32, #tpu.memory_space<vmem>>, vector<1x384xf32>
    %26 = arith.index_cast %c2_i32 : i32 to index
    %c0_9 = arith.constant 0 : index
    %27 = vector.load %arg3[%26, %c0_9] : memref<32x384xf32, #tpu.memory_space<vmem>>, vector<1x384xf32>
    tpu.vector_store %arg3[%26, %c0_9], %25 {strides = array<i32>} : memref<32x384xf32, #tpu.memory_space<vmem>>, vector<1x384xf32>,
    %c3_i32 = arith.constant 3 : i32
    %28 = arith.addi %0, %c3_i32 : i32
    %29 = arith.index_cast %28 : i32 to index
    %30 = memref.load %arg1[%29] : memref<32xi32, #tpu.memory_space<smem>>
    %c0_i32_10 = arith.constant 0 : i32
    %c15_i32_11 = arith.constant 15 : i32
    %31 = arith.maxsi %c0_i32_10, %30 : i32
    %32 = arith.minsi %c15_i32_11, %31 : i32
    %33 = arith.index_cast %32 : i32 to index
    %c0_12 = arith.constant 0 : index
    %34 = vector.load %arg2[%33, %c0_12] : memref<16x384xf32, #tpu.memory_space<vmem>>, vector<1x384xf32>
    %35 = arith.index_cast %c3_i32 : i32 to index
    %c0_13 = arith.constant 0 : index
    %36 = vector.load %arg3[%35, %c0_13] : memref<32x384xf32, #tpu.memory_space<vmem>>, vector<1x384xf32>
    tpu.vector_store %arg3[%35, %c0_13], %34 {strides = array<i32>} : memref<32x384xf32, #tpu.memory_space<vmem>>, vector<1x384xf32>,
    %c4_i32 = arith.constant 4 : i32
    %37 = arith.addi %0, %c4_i32 : i32
    %38 = arith.index_cast %37 : i32 to index
    %39 = memref.load %arg1[%38] : memref<32xi32, #tpu.memory_space<smem>>
    %c0_i32_14 = arith.constant 0 : i32
    %c15_i32_15 = arith.constant 15 : i32
    %40 = arith.maxsi %c0_i32_14, %39 : i32
    %41 = arith.minsi %c15_i32_15, %40 : i32
    %42 = arith.index_cast %41 : i32 to index
    %c0_16 = arith.constant 0 : index
    %43 = vector.load %arg2[%42, %c0_16] : memref<16x384xf32, #tpu.memory_space<vmem>>, vector<1x384xf32>
    %44 = arith.index_cast %c4_i32 : i32 to index
    %c0_17 = arith.constant 0 : index
    %45 = vector.load %arg3[%44, %c0_17] : memref<32x384xf32, #tpu.memory_space<vmem>>, vector<1x384xf32>
    tpu.vector_store %arg3[%44, %c0_17], %43 {strides = array<i32>} : memref<32x384xf32, #tpu.memory_space<vmem>>, vector<1x384xf32>,
    %c5_i32 = arith.constant 5 : i32
    %46 = arith.addi %0, %c5_i32 : i32
    %47 = arith.index_cast %46 : i32 to index
    %48 = memref.load %arg1[%47] : memref<32xi32, #tpu.memory_space<smem>>
    %c0_i32_18 = arith.constant 0 : i32
    %c15_i32_19 = arith.constant 15 : i32
    %49 = arith.maxsi %c0_i32_18, %48 : i32
    %50 = arith.minsi %c15_i32_19, %49 : i32
    %51 = arith.index_cast %50 : i32 to index
    %c0_20 = arith.constant 0 : index
    %52 = vector.load %arg2[%51, %c0_20] : memref<16x384xf32, #tpu.memory_space<vmem>>, vector<1x384xf32>
    %53 = arith.index_cast %c5_i32 : i32 to index
    %c0_21 = arith.constant 0 : index
    %54 = vector.load %arg3[%53, %c0_21] : memref<32x384xf32, #tpu.memory_space<vmem>>, vector<1x384xf32>
    tpu.vector_store %arg3[%53, %c0_21], %52 {strides = array<i32>} : memref<32x384xf32, #tpu.memory_space<vmem>>, vector<1x384xf32>,
    %c6_i32 = arith.constant 6 : i32
    %55 = arith.addi %0, %c6_i32 : i32
    %56 = arith.index_cast %55 : i32 to index
    %57 = memref.load %arg1[%56] : memref<32xi32, #tpu.memory_space<smem>>
    %c0_i32_22 = arith.constant 0 : i32
    %c15_i32_23 = arith.constant 15 : i32
    %58 = arith.maxsi %c0_i32_22, %57 : i32
    %59 = arith.minsi %c15_i32_23, %58 : i32
    %60 = arith.index_cast %59 : i32 to index
    %c0_24 = arith.constant 0 : index
    %61 = vector.load %arg2[%60, %c0_24] : memref<16x384xf32, #tpu.memory_space<vmem>>, vector<1x384xf32>
    %62 = arith.index_cast %c6_i32 : i32 to index
    %c0_25 = arith.constant 0 : index
    %63 = vector.load %arg3[%62, %c0_25] : memref<32x384xf32, #tpu.memory_space<vmem>>, vector<1x384xf32>
    tpu.vector_store %arg3[%62, %c0_25], %61 {strides = array<i32>} : memref<32x384xf32, #tpu.memory_space<vmem>>, vector<1x384xf32>,
    %c7_i32 = arith.constant 7 : i32
    %64 = arith.addi %0, %c7_i32 : i32
    %65 = arith.index_cast %64 : i32 to index
    %66 = memref.load %arg1[%65] : memref<32xi32, #tpu.memory_space<smem>>
    %c0_i32_26 = arith.constant 0 : i32
    %c15_i32_27 = arith.constant 15 : i32
    %67 = arith.maxsi %c0_i32_26, %66 : i32
    %68 = arith.minsi %c15_i32_27, %67 : i32
    %69 = arith.index_cast %68 : i32 to index
    %c0_28 = arith.constant 0 : index
    %70 = vector.load %arg2[%69, %c0_28] : memref<16x384xf32, #tpu.memory_space<vmem>>, vector<1x384xf32>
    %71 = arith.index_cast %c7_i32 : i32 to index
    %c0_29 = arith.constant 0 : index
    %72 = vector.load %arg3[%71, %c0_29] : memref<32x384xf32, #tpu.memory_space<vmem>>, vector<1x384xf32>
    tpu.vector_store %arg3[%71, %c0_29], %70 {strides = array<i32>} : memref<32x384xf32, #tpu.memory_space<vmem>>, vector<1x384xf32>,
    %c8_i32 = arith.constant 8 : i32
    %73 = arith.addi %0, %c8_i32 : i32
    %74 = arith.index_cast %73 : i32 to index
    %75 = memref.load %arg1[%74] : memref<32xi32, #tpu.memory_space<smem>>
    %c0_i32_30 = arith.constant 0 : i32
    %c15_i32_31 = arith.constant 15 : i32
    %76 = arith.maxsi %c0_i32_30, %75 : i32
    %77 = arith.minsi %c15_i32_31, %76 : i32
    %78 = arith.index_cast %77 : i32 to index
    %c0_32 = arith.constant 0 : index
    %79 = vector.load %arg2[%78, %c0_32] : memref<16x384xf32, #tpu.memory_space<vmem>>, vector<1x384xf32>
    %80 = arith.index_cast %c8_i32 : i32 to index
    %c0_33 = arith.constant 0 : index
    %81 = vector.load %arg3[%80, %c0_33] : memref<32x384xf32, #tpu.memory_space<vmem>>, vector<1x384xf32>
    tpu.vector_store %arg3[%80, %c0_33], %79 {strides = array<i32>} : memref<32x384xf32, #tpu.memory_space<vmem>>, vector<1x384xf32>,
    %c9_i32 = arith.constant 9 : i32
    %82 = arith.addi %0, %c9_i32 : i32
    %83 = arith.index_cast %82 : i32 to index
    %84 = memref.load %arg1[%83] : memref<32xi32, #tpu.memory_space<smem>>
    %c0_i32_34 = arith.constant 0 : i32
    %c15_i32_35 = arith.constant 15 : i32
    %85 = arith.maxsi %c0_i32_34, %84 : i32
    %86 = arith.minsi %c15_i32_35, %85 : i32
    %87 = arith.index_cast %86 : i32 to index
    %c0_36 = arith.constant 0 : index
    %88 = vector.load %arg2[%87, %c0_36] : memref<16x384xf32, #tpu.memory_space<vmem>>, vector<1x384xf32>
    %89 = arith.index_cast %c9_i32 : i32 to index
    %c0_37 = arith.constant 0 : index
    %90 = vector.load %arg3[%89, %c0_37] : memref<32x384xf32, #tpu.memory_space<vmem>>, vector<1x384xf32>
    tpu.vector_store %arg3[%89, %c0_37], %88 {strides = array<i32>} : memref<32x384xf32, #tpu.memory_space<vmem>>, vector<1x384xf32>,
    %c10_i32 = arith.constant 10 : i32
    %91 = arith.addi %0, %c10_i32 : i32
    %92 = arith.index_cast %91 : i32 to index
    %93 = memref.load %arg1[%92] : memref<32xi32, #tpu.memory_space<smem>>
    %c0_i32_38 = arith.constant 0 : i32
    %c15_i32_39 = arith.constant 15 : i32
    %94 = arith.maxsi %c0_i32_38, %93 : i32
    %95 = arith.minsi %c15_i32_39, %94 : i32
    %96 = arith.index_cast %95 : i32 to index
    %c0_40 = arith.constant 0 : index
    %97 = vector.load %arg2[%96, %c0_40] : memref<16x384xf32, #tpu.memory_space<vmem>>, vector<1x384xf32>
    %98 = arith.index_cast %c10_i32 : i32 to index
    %c0_41 = arith.constant 0 : index
    %99 = vector.load %arg3[%98, %c0_41] : memref<32x384xf32, #tpu.memory_space<vmem>>, vector<1x384xf32>
    tpu.vector_store %arg3[%98, %c0_41], %97 {strides = array<i32>} : memref<32x384xf32, #tpu.memory_space<vmem>>, vector<1x384xf32>,
    %c11_i32 = arith.constant 11 : i32
    %100 = arith.addi %0, %c11_i32 : i32
    %101 = arith.index_cast %100 : i32 to index
    %102 = memref.load %arg1[%101] : memref<32xi32, #tpu.memory_space<smem>>
    %c0_i32_42 = arith.constant 0 : i32
    %c15_i32_43 = arith.constant 15 : i32
    %103 = arith.maxsi %c0_i32_42, %102 : i32
    %104 = arith.minsi %c15_i32_43, %103 : i32
    %105 = arith.index_cast %104 : i32 to index
    %c0_44 = arith.constant 0 : index
    %106 = vector.load %arg2[%105, %c0_44] : memref<16x384xf32, #tpu.memory_space<vmem>>, vector<1x384xf32>
    %107 = arith.index_cast %c11_i32 : i32 to index
    %c0_45 = arith.constant 0 : index
    %108 = vector.load %arg3[%107, %c0_45] : memref<32x384xf32, #tpu.memory_space<vmem>>, vector<1x384xf32>
    tpu.vector_store %arg3[%107, %c0_45], %106 {strides = array<i32>} : memref<32x384xf32, #tpu.memory_space<vmem>>, vector<1x384xf32>,
    %c12_i32 = arith.constant 12 : i32
    %109 = arith.addi %0, %c12_i32 : i32
    %110 = arith.index_cast %109 : i32 to index
    %111 = memref.load %arg1[%110] : memref<32xi32, #tpu.memory_space<smem>>
    %c0_i32_46 = arith.constant 0 : i32
    %c15_i32_47 = arith.constant 15 : i32
    %112 = arith.maxsi %c0_i32_46, %111 : i32
    %113 = arith.minsi %c15_i32_47, %112 : i32
    %114 = arith.index_cast %113 : i32 to index
    %c0_48 = arith.constant 0 : index
    %115 = vector.load %arg2[%114, %c0_48] : memref<16x384xf32, #tpu.memory_space<vmem>>, vector<1x384xf32>
    %116 = arith.index_cast %c12_i32 : i32 to index
    %c0_49 = arith.constant 0 : index
    %117 = vector.load %arg3[%116, %c0_49] : memref<32x384xf32, #tpu.memory_space<vmem>>, vector<1x384xf32>
    tpu.vector_store %arg3[%116, %c0_49], %115 {strides = array<i32>} : memref<32x384xf32, #tpu.memory_space<vmem>>, vector<1x384xf32>,
    %c13_i32 = arith.constant 13 : i32
    %118 = arith.addi %0, %c13_i32 : i32
    %119 = arith.index_cast %118 : i32 to index
    %120 = memref.load %arg1[%119] : memref<32xi32, #tpu.memory_space<smem>>
    %c0_i32_50 = arith.constant 0 : i32
    %c15_i32_51 = arith.constant 15 : i32
    %121 = arith.maxsi %c0_i32_50, %120 : i32
    %122 = arith.minsi %c15_i32_51, %121 : i32
    %123 = arith.index_cast %122 : i32 to index
    %c0_52 = arith.constant 0 : index
    %124 = vector.load %arg2[%123, %c0_52] : memref<16x384xf32, #tpu.memory_space<vmem>>, vector<1x384xf32>
    %125 = arith.index_cast %c13_i32 : i32 to index
    %c0_53 = arith.constant 0 : index
    %126 = vector.load %arg3[%125, %c0_53] : memref<32x384xf32, #tpu.memory_space<vmem>>, vector<1x384xf32>
    tpu.vector_store %arg3[%125, %c0_53], %124 {strides = array<i32>} : memref<32x384xf32, #tpu.memory_space<vmem>>, vector<1x384xf32>,
    %c14_i32 = arith.constant 14 : i32
    %127 = arith.addi %0, %c14_i32 : i32
    %128 = arith.index_cast %127 : i32 to index
    %129 = memref.load %arg1[%128] : memref<32xi32, #tpu.memory_space<smem>>
    %c0_i32_54 = arith.constant 0 : i32
    %c15_i32_55 = arith.constant 15 : i32
    %130 = arith.maxsi %c0_i32_54, %129 : i32
    %131 = arith.minsi %c15_i32_55, %130 : i32
    %132 = arith.index_cast %131 : i32 to index
    %c0_56 = arith.constant 0 : index
    %133 = vector.load %arg2[%132, %c0_56] : memref<16x384xf32, #tpu.memory_space<vmem>>, vector<1x384xf32>
    %134 = arith.index_cast %c14_i32 : i32 to index
    %c0_57 = arith.constant 0 : index
    %135 = vector.load %arg3[%134, %c0_57] : memref<32x384xf32, #tpu.memory_space<vmem>>, vector<1x384xf32>
    tpu.vector_store %arg3[%134, %c0_57], %133 {strides = array<i32>} : memref<32x384xf32, #tpu.memory_space<vmem>>, vector<1x384xf32>,
    %c15_i32_58 = arith.constant 15 : i32
    %136 = arith.addi %0, %c15_i32_58 : i32
    %137 = arith.index_cast %136 : i32 to index
    %138 = memref.load %arg1[%137] : memref<32xi32, #tpu.memory_space<smem>>
    %c0_i32_59 = arith.constant 0 : i32
    %c15_i32_60 = arith.constant 15 : i32
    %139 = arith.maxsi %c0_i32_59, %138 : i32
    %140 = arith.minsi %c15_i32_60, %139 : i32
    %141 = arith.index_cast %140 : i32 to index
    %c0_61 = arith.constant 0 : index
    %142 = vector.load %arg2[%141, %c0_61] : memref<16x384xf32, #tpu.memory_space<vmem>>, vector<1x384xf32>
    %143 = arith.index_cast %c15_i32_58 : i32 to index
    %c0_62 = arith.constant 0 : index
    %144 = vector.load %arg3[%143, %c0_62] : memref<32x384xf32, #tpu.memory_space<vmem>>, vector<1x384xf32>
    tpu.vector_store %arg3[%143, %c0_62], %142 {strides = array<i32>} : memref<32x384xf32, #tpu.memory_space<vmem>>, vector<1x384xf32>,
    %c16_i32 = arith.constant 16 : i32
    %145 = arith.addi %0, %c16_i32 : i32
    %146 = arith.index_cast %145 : i32 to index
    %147 = memref.load %arg1[%146] : memref<32xi32, #tpu.memory_space<smem>>
    %c0_i32_63 = arith.constant 0 : i32
    %c15_i32_64 = arith.constant 15 : i32
    %148 = arith.maxsi %c0_i32_63, %147 : i32
    %149 = arith.minsi %c15_i32_64, %148 : i32
    %150 = arith.index_cast %149 : i32 to index
    %c0_65 = arith.constant 0 : index
    %151 = vector.load %arg2[%150, %c0_65] : memref<16x384xf32, #tpu.memory_space<vmem>>, vector<1x384xf32>
    %152 = arith.index_cast %c16_i32 : i32 to index
    %c0_66 = arith.constant 0 : index
    %153 = vector.load %arg3[%152, %c0_66] : memref<32x384xf32, #tpu.memory_space<vmem>>, vector<1x384xf32>
    tpu.vector_store %arg3[%152, %c0_66], %151 {strides = array<i32>} : memref<32x384xf32, #tpu.memory_space<vmem>>, vector<1x384xf32>,
    %c17_i32 = arith.constant 17 : i32
    %154 = arith.addi %0, %c17_i32 : i32
    %155 = arith.index_cast %154 : i32 to index
    %156 = memref.load %arg1[%155] : memref<32xi32, #tpu.memory_space<smem>>
    %c0_i32_67 = arith.constant 0 : i32
    %c15_i32_68 = arith.constant 15 : i32
    %157 = arith.maxsi %c0_i32_67, %156 : i32
    %158 = arith.minsi %c15_i32_68, %157 : i32
    %159 = arith.index_cast %158 : i32 to index
    %c0_69 = arith.constant 0 : index
    %160 = vector.load %arg2[%159, %c0_69] : memref<16x384xf32, #tpu.memory_space<vmem>>, vector<1x384xf32>
    %161 = arith.index_cast %c17_i32 : i32 to index
    %c0_70 = arith.constant 0 : index
    %162 = vector.load %arg3[%161, %c0_70] : memref<32x384xf32, #tpu.memory_space<vmem>>, vector<1x384xf32>
    tpu.vector_store %arg3[%161, %c0_70], %160 {strides = array<i32>} : memref<32x384xf32, #tpu.memory_space<vmem>>, vector<1x384xf32>,
    %c18_i32 = arith.constant 18 : i32
    %163 = arith.addi %0, %c18_i32 : i32
    %164 = arith.index_cast %163 : i32 to index
    %165 = memref.load %arg1[%164] : memref<32xi32, #tpu.memory_space<smem>>
    %c0_i32_71 = arith.constant 0 : i32
    %c15_i32_72 = arith.constant 15 : i32
    %166 = arith.maxsi %c0_i32_71, %165 : i32
    %167 = arith.minsi %c15_i32_72, %166 : i32
    %168 = arith.index_cast %167 : i32 to index
    %c0_73 = arith.constant 0 : index
    %169 = vector.load %arg2[%168, %c0_73] : memref<16x384xf32, #tpu.memory_space<vmem>>, vector<1x384xf32>
    %170 = arith.index_cast %c18_i32 : i32 to index
    %c0_74 = arith.constant 0 : index
    %171 = vector.load %arg3[%170, %c0_74] : memref<32x384xf32, #tpu.memory_space<vmem>>, vector<1x384xf32>
    tpu.vector_store %arg3[%170, %c0_74], %169 {strides = array<i32>} : memref<32x384xf32, #tpu.memory_space<vmem>>, vector<1x384xf32>,
    %c19_i32 = arith.constant 19 : i32
    %172 = arith.addi %0, %c19_i32 : i32
    %173 = arith.index_cast %172 : i32 to index
    %174 = memref.load %arg1[%173] : memref<32xi32, #tpu.memory_space<smem>>
    %c0_i32_75 = arith.constant 0 : i32
    %c15_i32_76 = arith.constant 15 : i32
    %175 = arith.maxsi %c0_i32_75, %174 : i32
    %176 = arith.minsi %c15_i32_76, %175 : i32
    %177 = arith.index_cast %176 : i32 to index
    %c0_77 = arith.constant 0 : index
    %178 = vector.load %arg2[%177, %c0_77] : memref<16x384xf32, #tpu.memory_space<vmem>>, vector<1x384xf32>
    %179 = arith.index_cast %c19_i32 : i32 to index
    %c0_78 = arith.constant 0 : index
    %180 = vector.load %arg3[%179, %c0_78] : memref<32x384xf32, #tpu.memory_space<vmem>>, vector<1x384xf32>
    tpu.vector_store %arg3[%179, %c0_78], %178 {strides = array<i32>} : memref<32x384xf32, #tpu.memory_space<vmem>>, vector<1x384xf32>,
    %c20_i32 = arith.constant 20 : i32
    %181 = arith.addi %0, %c20_i32 : i32
    %182 = arith.index_cast %181 : i32 to index
    %183 = memref.load %arg1[%182] : memref<32xi32, #tpu.memory_space<smem>>
    %c0_i32_79 = arith.constant 0 : i32
    %c15_i32_80 = arith.constant 15 : i32
    %184 = arith.maxsi %c0_i32_79, %183 : i32
    %185 = arith.minsi %c15_i32_80, %184 : i32
    %186 = arith.index_cast %185 : i32 to index
    %c0_81 = arith.constant 0 : index
    %187 = vector.load %arg2[%186, %c0_81] : memref<16x384xf32, #tpu.memory_space<vmem>>, vector<1x384xf32>
    %188 = arith.index_cast %c20_i32 : i32 to index
    %c0_82 = arith.constant 0 : index
    %189 = vector.load %arg3[%188, %c0_82] : memref<32x384xf32, #tpu.memory_space<vmem>>, vector<1x384xf32>
    tpu.vector_store %arg3[%188, %c0_82], %187 {strides = array<i32>} : memref<32x384xf32, #tpu.memory_space<vmem>>, vector<1x384xf32>,
    %c21_i32 = arith.constant 21 : i32
    %190 = arith.addi %0, %c21_i32 : i32
    %191 = arith.index_cast %190 : i32 to index
    %192 = memref.load %arg1[%191] : memref<32xi32, #tpu.memory_space<smem>>
    %c0_i32_83 = arith.constant 0 : i32
    %c15_i32_84 = arith.constant 15 : i32
    %193 = arith.maxsi %c0_i32_83, %192 : i32
    %194 = arith.minsi %c15_i32_84, %193 : i32
    %195 = arith.index_cast %194 : i32 to index
    %c0_85 = arith.constant 0 : index
    %196 = vector.load %arg2[%195, %c0_85] : memref<16x384xf32, #tpu.memory_space<vmem>>, vector<1x384xf32>
    %197 = arith.index_cast %c21_i32 : i32 to index
    %c0_86 = arith.constant 0 : index
    %198 = vector.load %arg3[%197, %c0_86] : memref<32x384xf32, #tpu.memory_space<vmem>>, vector<1x384xf32>
    tpu.vector_store %arg3[%197, %c0_86], %196 {strides = array<i32>} : memref<32x384xf32, #tpu.memory_space<vmem>>, vector<1x384xf32>,
    %c22_i32 = arith.constant 22 : i32
    %199 = arith.addi %0, %c22_i32 : i32
    %200 = arith.index_cast %199 : i32 to index
    %201 = memref.load %arg1[%200] : memref<32xi32, #tpu.memory_space<smem>>
    %c0_i32_87 = arith.constant 0 : i32
    %c15_i32_88 = arith.constant 15 : i32
    %202 = arith.maxsi %c0_i32_87, %201 : i32
    %203 = arith.minsi %c15_i32_88, %202 : i32
    %204 = arith.index_cast %203 : i32 to index
    %c0_89 = arith.constant 0 : index
    %205 = vector.load %arg2[%204, %c0_89] : memref<16x384xf32, #tpu.memory_space<vmem>>, vector<1x384xf32>
    %206 = arith.index_cast %c22_i32 : i32 to index
    %c0_90 = arith.constant 0 : index
    %207 = vector.load %arg3[%206, %c0_90] : memref<32x384xf32, #tpu.memory_space<vmem>>, vector<1x384xf32>
    tpu.vector_store %arg3[%206, %c0_90], %205 {strides = array<i32>} : memref<32x384xf32, #tpu.memory_space<vmem>>, vector<1x384xf32>,
    %c23_i32 = arith.constant 23 : i32
    %208 = arith.addi %0, %c23_i32 : i32
    %209 = arith.index_cast %208 : i32 to index
    %210 = memref.load %arg1[%209] : memref<32xi32, #tpu.memory_space<smem>>
    %c0_i32_91 = arith.constant 0 : i32
    %c15_i32_92 = arith.constant 15 : i32
    %211 = arith.maxsi %c0_i32_91, %210 : i32
    %212 = arith.minsi %c15_i32_92, %211 : i32
    %213 = arith.index_cast %212 : i32 to index
    %c0_93 = arith.constant 0 : index
    %214 = vector.load %arg2[%213, %c0_93] : memref<16x384xf32, #tpu.memory_space<vmem>>, vector<1x384xf32>
    %215 = arith.index_cast %c23_i32 : i32 to index
    %c0_94 = arith.constant 0 : index
    %216 = vector.load %arg3[%215, %c0_94] : memref<32x384xf32, #tpu.memory_space<vmem>>, vector<1x384xf32>
    tpu.vector_store %arg3[%215, %c0_94], %214 {strides = array<i32>} : memref<32x384xf32, #tpu.memory_space<vmem>>, vector<1x384xf32>,
    %c24_i32 = arith.constant 24 : i32
    %217 = arith.addi %0, %c24_i32 : i32
    %218 = arith.index_cast %217 : i32 to index
    %219 = memref.load %arg1[%218] : memref<32xi32, #tpu.memory_space<smem>>
    %c0_i32_95 = arith.constant 0 : i32
    %c15_i32_96 = arith.constant 15 : i32
    %220 = arith.maxsi %c0_i32_95, %219 : i32
    %221 = arith.minsi %c15_i32_96, %220 : i32
    %222 = arith.index_cast %221 : i32 to index
    %c0_97 = arith.constant 0 : index
    %223 = vector.load %arg2[%222, %c0_97] : memref<16x384xf32, #tpu.memory_space<vmem>>, vector<1x384xf32>
    %224 = arith.index_cast %c24_i32 : i32 to index
    %c0_98 = arith.constant 0 : index
    %225 = vector.load %arg3[%224, %c0_98] : memref<32x384xf32, #tpu.memory_space<vmem>>, vector<1x384xf32>
    tpu.vector_store %arg3[%224, %c0_98], %223 {strides = array<i32>} : memref<32x384xf32, #tpu.memory_space<vmem>>, vector<1x384xf32>,
    %c25_i32 = arith.constant 25 : i32
    %226 = arith.addi %0, %c25_i32 : i32
    %227 = arith.index_cast %226 : i32 to index
    %228 = memref.load %arg1[%227] : memref<32xi32, #tpu.memory_space<smem>>
    %c0_i32_99 = arith.constant 0 : i32
    %c15_i32_100 = arith.constant 15 : i32
    %229 = arith.maxsi %c0_i32_99, %228 : i32
    %230 = arith.minsi %c15_i32_100, %229 : i32
    %231 = arith.index_cast %230 : i32 to index
    %c0_101 = arith.constant 0 : index
    %232 = vector.load %arg2[%231, %c0_101] : memref<16x384xf32, #tpu.memory_space<vmem>>, vector<1x384xf32>
    %233 = arith.index_cast %c25_i32 : i32 to index
    %c0_102 = arith.constant 0 : index
    %234 = vector.load %arg3[%233, %c0_102] : memref<32x384xf32, #tpu.memory_space<vmem>>, vector<1x384xf32>
    tpu.vector_store %arg3[%233, %c0_102], %232 {strides = array<i32>} : memref<32x384xf32, #tpu.memory_space<vmem>>, vector<1x384xf32>,
    %c26_i32 = arith.constant 26 : i32
    %235 = arith.addi %0, %c26_i32 : i32
    %236 = arith.index_cast %235 : i32 to index
    %237 = memref.load %arg1[%236] : memref<32xi32, #tpu.memory_space<smem>>
    %c0_i32_103 = arith.constant 0 : i32
    %c15_i32_104 = arith.constant 15 : i32
    %238 = arith.maxsi %c0_i32_103, %237 : i32
    %239 = arith.minsi %c15_i32_104, %238 : i32
    %240 = arith.index_cast %239 : i32 to index
    %c0_105 = arith.constant 0 : index
    %241 = vector.load %arg2[%240, %c0_105] : memref<16x384xf32, #tpu.memory_space<vmem>>, vector<1x384xf32>
    %242 = arith.index_cast %c26_i32 : i32 to index
    %c0_106 = arith.constant 0 : index
    %243 = vector.load %arg3[%242, %c0_106] : memref<32x384xf32, #tpu.memory_space<vmem>>, vector<1x384xf32>
    tpu.vector_store %arg3[%242, %c0_106], %241 {strides = array<i32>} : memref<32x384xf32, #tpu.memory_space<vmem>>, vector<1x384xf32>,
    %c27_i32 = arith.constant 27 : i32
    %244 = arith.addi %0, %c27_i32 : i32
    %245 = arith.index_cast %244 : i32 to index
    %246 = memref.load %arg1[%245] : memref<32xi32, #tpu.memory_space<smem>>
    %c0_i32_107 = arith.constant 0 : i32
    %c15_i32_108 = arith.constant 15 : i32
    %247 = arith.maxsi %c0_i32_107, %246 : i32
    %248 = arith.minsi %c15_i32_108, %247 : i32
    %249 = arith.index_cast %248 : i32 to index
    %c0_109 = arith.constant 0 : index
    %250 = vector.load %arg2[%249, %c0_109] : memref<16x384xf32, #tpu.memory_space<vmem>>, vector<1x384xf32>
    %251 = arith.index_cast %c27_i32 : i32 to index
    %c0_110 = arith.constant 0 : index
    %252 = vector.load %arg3[%251, %c0_110] : memref<32x384xf32, #tpu.memory_space<vmem>>, vector<1x384xf32>
    tpu.vector_store %arg3[%251, %c0_110], %250 {strides = array<i32>} : memref<32x384xf32, #tpu.memory_space<vmem>>, vector<1x384xf32>,
    %c28_i32 = arith.constant 28 : i32
    %253 = arith.addi %0, %c28_i32 : i32
    %254 = arith.index_cast %253 : i32 to index
    %255 = memref.load %arg1[%254] : memref<32xi32, #tpu.memory_space<smem>>
    %c0_i32_111 = arith.constant 0 : i32
    %c15_i32_112 = arith.constant 15 : i32
    %256 = arith.maxsi %c0_i32_111, %255 : i32
    %257 = arith.minsi %c15_i32_112, %256 : i32
    %258 = arith.index_cast %257 : i32 to index
    %c0_113 = arith.constant 0 : index
    %259 = vector.load %arg2[%258, %c0_113] : memref<16x384xf32, #tpu.memory_space<vmem>>, vector<1x384xf32>
    %260 = arith.index_cast %c28_i32 : i32 to index
    %c0_114 = arith.constant 0 : index
    %261 = vector.load %arg3[%260, %c0_114] : memref<32x384xf32, #tpu.memory_space<vmem>>, vector<1x384xf32>
    tpu.vector_store %arg3[%260, %c0_114], %259 {strides = array<i32>} : memref<32x384xf32, #tpu.memory_space<vmem>>, vector<1x384xf32>,
    %c29_i32 = arith.constant 29 : i32
    %262 = arith.addi %0, %c29_i32 : i32
    %263 = arith.index_cast %262 : i32 to index
    %264 = memref.load %arg1[%263] : memref<32xi32, #tpu.memory_space<smem>>
    %c0_i32_115 = arith.constant 0 : i32
    %c15_i32_116 = arith.constant 15 : i32
    %265 = arith.maxsi %c0_i32_115, %264 : i32
    %266 = arith.minsi %c15_i32_116, %265 : i32
    %267 = arith.index_cast %266 : i32 to index
    %c0_117 = arith.constant 0 : index
    %268 = vector.load %arg2[%267, %c0_117] : memref<16x384xf32, #tpu.memory_space<vmem>>, vector<1x384xf32>
    %269 = arith.index_cast %c29_i32 : i32 to index
    %c0_118 = arith.constant 0 : index
    %270 = vector.load %arg3[%269, %c0_118] : memref<32x384xf32, #tpu.memory_space<vmem>>, vector<1x384xf32>
    tpu.vector_store %arg3[%269, %c0_118], %268 {strides = array<i32>} : memref<32x384xf32, #tpu.memory_space<vmem>>, vector<1x384xf32>,
    %c30_i32 = arith.constant 30 : i32
    %271 = arith.addi %0, %c30_i32 : i32
    %272 = arith.index_cast %271 : i32 to index
    %273 = memref.load %arg1[%272] : memref<32xi32, #tpu.memory_space<smem>>
    %c0_i32_119 = arith.constant 0 : i32
    %c15_i32_120 = arith.constant 15 : i32
    %274 = arith.maxsi %c0_i32_119, %273 : i32
    %275 = arith.minsi %c15_i32_120, %274 : i32
    %276 = arith.index_cast %275 : i32 to index
    %c0_121 = arith.constant 0 : index
    %277 = vector.load %arg2[%276, %c0_121] : memref<16x384xf32, #tpu.memory_space<vmem>>, vector<1x384xf32>
    %278 = arith.index_cast %c30_i32 : i32 to index
    %c0_122 = arith.constant 0 : index
    %279 = vector.load %arg3[%278, %c0_122] : memref<32x384xf32, #tpu.memory_space<vmem>>, vector<1x384xf32>
    tpu.vector_store %arg3[%278, %c0_122], %277 {strides = array<i32>} : memref<32x384xf32, #tpu.memory_space<vmem>>, vector<1x384xf32>,
    %c31_i32 = arith.constant 31 : i32
    %280 = arith.addi %0, %c31_i32 : i32
    %281 = arith.index_cast %280 : i32 to index
    %282 = memref.load %arg1[%281] : memref<32xi32, #tpu.memory_space<smem>>
    %c0_i32_123 = arith.constant 0 : i32
    %c15_i32_124 = arith.constant 15 : i32
    %283 = arith.maxsi %c0_i32_123, %282 : i32
    %284 = arith.minsi %c15_i32_124, %283 : i32
    %285 = arith.index_cast %284 : i32 to index
    %c0_125 = arith.constant 0 : index
    %286 = vector.load %arg2[%285, %c0_125] : memref<16x384xf32, #tpu.memory_space<vmem>>, vector<1x384xf32>
    %287 = arith.index_cast %c31_i32 : i32 to index
    %c0_126 = arith.constant 0 : index
    %288 = vector.load %arg3[%287, %c0_126] : memref<32x384xf32, #tpu.memory_space<vmem>>, vector<1x384xf32>
    tpu.vector_store %arg3[%287, %c0_126], %286 {strides = array<i32>} : memref<32x384xf32, #tpu.memory_space<vmem>>, vector<1x384xf32>,
    %c32_i32_127 = arith.constant 32 : i32
    return
  }
  func.func @transform_0(%arg0: i32, %arg1: memref<32xi32, #tpu.memory_space<smem>>) -> (i32, i32) {
    %c0_i32 = arith.constant 0 : i32
    %c0_i32_0 = arith.constant 0 : i32
    %c0_i32_1 = arith.constant 0 : i32
    return %c0_i32, %c0_i32_0 : i32, i32
  }
  func.func @transform_1(%arg0: i32, %arg1: memref<32xi32, #tpu.memory_space<smem>>) -> (i32, i32) {
    %c0_i32 = arith.constant 0 : i32
    %c0_i32_0 = arith.constant 0 : i32
    return %arg0, %c0_i32 : i32, i32
  }
}

</mosaic_0001>

<bundles_post_ra>
// kernel: tpu_custom_call.1
= control target key start
LH: loop header
LB: loop body
LE: loop exit
PB: predicated region body
PF: predicated region fallthrough
CT: control target
= control target key end

     0   :  { %s1302_s0 = inlined_call_operand.hbm [shape: s32[32], index: 0, kind: input, shape index: {}]   ;;  %s1303_s1 = inlined_call_operand.hbm [shape: f32[16,384], index: 1, kind: input, shape index: {}]   ;;  %s1304_s2 = inlined_call_operand.hbm [shape: f32[32,384], index: 2, kind: output, shape index: {}]  }
   0x1   :  { %s1012_s11 = scalar_lea.hbm %s1302_s0, 16 }
   0x2   :  { %p1013_p0 = scmp.ne.s32.totalorder %s1302_s0, %s1012_s11  ;;  %p1016_p1 = scmp.lt.u32.totalorder %s1012_s11, %s1302_s0 }
   0x4   :  { %p1018_p2 = pnand %p1016_p1, %p1013_p0 }
   0x6   :  { %1021 = shalt.err (!%p1018_p2)  }
   0x7   :  { %s1072_s16 = smov [#allocation3]  }
   0x8   :  { %8 = dma.hbm_to_smem %s1302_s0, 16, %s1072_s16, [#allocation2] }
   0x9   :  { %1066 = dma.done.wait [#allocation2], 16 }
   0xa   :  { %1067 = vsyncadd [#allocation2], 4294967280 }
   0xb   :  { %10 = sfence }
   0xc   :  { %11 = vsyncpa [#allocation5], 0 }
   0xd   :  { %12 = vsyncpa [#allocation6], 0  ;;  %s1073_s19 = smov [#allocation4]   ;;  %s1022_s23 = scalar_lea.hbm %s1303_s1, 768 }
   0xe   :  { %s18_s20 = sshll.u32 %s1073_s19, 4  ;;  %p1023_p3 = scmp.ne.s32.totalorder %s1303_s1, %s1022_s23  ;;  %s19_s20 = int_to_ptr.vmem [resolvable:$true] %s18_s20 }
   0xf   :  { %p1026_p4 = scmp.lt.u32.totalorder %s1022_s23, %s1303_s1 }
  0x11   :  { %p1028_p5 = pnand %p1026_p4, %p1023_p3 }
  0x13   :  { %1031 = shalt.err (!%p1028_p5)
}
  0x14   :  { %s1032_s0 = scalar_lea.vmem %s19_s20, 768  ;;  %p1037_p7 = scmp.lt.s32.totalorder %s19_s20, %s19_s20 }
  0x15   :  { %p1033_p6 = scmp.ne.s32.totalorder %s19_s20, %s1032_s0  ;;  %p1038_p8 = scmp.lt.s32.totalorder %s1032_s0, %s1032_s0 }
  0x17   :  { %p1039_p9 = por %p1038_p8, %p1037_p7 }
  0x19   :  { %p1040_p10 = pnand %p1039_p9, %p1033_p6 }
  0x1b   :  { %1043 = shalt.err (!%p1040_p10)
}
  0x1c   :  { %s1074_s28 = smov 384   ;;  %s1075_s29 = smov 24  }
  0x1d   :  { %24 = dma.hbm_to_vmem [thread:$0]  %s1303_s1, 768, %s19_s20, [#allocation5], %s1074_s28, %s1074_s28, %s1075_s29  }
  0x1e   :  { %1068 = dma.done.wait [#allocation5], 768  }
  0x1f   :  { %1069 = vsyncadd [#allocation5], 4294966528  ;;  %s29_s4 = sld [smem:[#allocation3]]  ;;  %s726_s5 = sld [smem:[#allocation3 + $0x1]]  ;;  %v43_v0 = vlaneseq }
  0x20   :  { %s1119_s6 = sld [smem:[#allocation3 + $0x2]]  ;;  %s1121_s7 = sld [smem:[#allocation3 + $0x3]] }
  0x21   :  { %s1123_s8 = sld [smem:[#allocation3 + $0x4]]  ;;  %s1125_s9 = sld [smem:[#allocation3 + $0x5]]  ;;  %vm1139_vm0 = vcmp.lt.s32.totalorder %v43_v0, 384 }
  0x22   :  { %s1127_s10 = sld [smem:[#allocation3 + $0x6]]  ;;  %s1129_s11 = sld [smem:[#allocation3 + $0x7]] }
  0x23   :  { %s1131_s12 = sld [smem:[#allocation3 + $0x8]]  ;;  %s1133_s13 = sld [smem:[#allocation3 + $0x9]] }
  0x24   :  { %s1135_s1 = sld [smem:[#allocation3 + $0xa]]  ;;  %s1137_s14 = sld [smem:[#allocation3 + $0xb]] }
  0x25   :  { %p30_p11 = scmp.gt.s32.totalorder %s29_s4, 0  ;;  %p720_p12 = scmp.lt.s32.totalorder %s29_s4, 15 }
  0x26   :  { %p51_p13 = scmp.gt.s32.totalorder %s726_s5, 0  ;;  %p727_p0 = scmp.lt.s32.totalorder %s726_s5, 15 }
  0x27   :  { %s1308_s4 = smov (!%p30_p11, %s29_s4), 0  ;;  %p69_p1 = scmp.gt.s32.totalorder %s1119_s6, 0 }
  0x28   :  { %s1310_s5 = smov (!%p51_p13, %s726_s5), 0  ;;  %s1312_s4 = smov (!%p720_p12, %s1308_s4), 15 }
  0x29   :  { %s1314_s5 = smov (!%p727_p0, %s1310_s5), 15  ;;  %s34_s15 = sshra.s32 %s1312_s4, 3 }
  0x2a   :  { %s37_s16 = sand.u32 7, %s1312_s4  ;;  %s725_s17 = smul.u32 24, %s34_s15 }
  0x2b   :  { %s55_s18 = sshra.s32 %s1314_s5, 3  ;;  %s58_s19 = sand.u32 7, %s1314_s5 }
  0x2c   :  { %s732_s20 = smul.u32 24, %s55_s18  ;;  %s40_s21 = sadd.s32 %s725_s17, %s37_s16 }
  0x2d   :  { %s41_s23 = scalar_lea.vmem [#allocation4], %s40_s21  ;;  %p734_p2 = scmp.lt.s32.totalorder %s1119_s6, 15 }
  0x2e   :  { %s61_s22 = sadd.s32 %s732_s20, %s58_s19  ;;  %v42_v2 = vld [vmem:[%s41_s23] ss:$8 sm:$0x7]  ;;  %s1316_s6 = smov (!%p69_p1, %s1119_s6), 0 }
  0x2f   :  { %47 = vst.msk [vmem:[#allocation7] ss:$8 sm:$0x7] %vm1139_vm0, %v42_v2  ;;  %s62_s24 = scalar_lea.vmem [#allocation4], %s61_s22  ;;  %p87_p3 = scmp.gt.s32.totalorder %s1121_s7, 0 }
  0x30   :  { %v63_v3 = vld [vmem:[%s62_s24] ss:$8 sm:$0x7]  ;;  %p741_p4 = scmp.lt.s32.totalorder %s1121_s7, 15  ;;  %s1318_s6 = smov (!%p734_p2, %s1316_s6), 15 }
  0x31   :  { %65 = vst.msk [vmem:[#allocation7 + $0x1] ss:$8 sm:$0x7] %vm1139_vm0, %v63_v3  ;;  %s1320_s7 = smov (!%p87_p3, %s1121_s7), 0  ;;  %s73_s25 = sshra.s32 %s1318_s6, 3 }
  0x32   :  { %s76_s26 = sand.u32 7, %s1318_s6  ;;  %s739_s27 = smul.u32 24, %s73_s25 }
  0x33   :  { %p105_p5 = scmp.gt.s32.totalorder %s1123_s8, 0  ;;  %s1322_s7 = smov (!%p741_p4, %s1320_s7), 15 }
  0x34   :  { %s79_s0 = sadd.s32 %s739_s27, %s76_s26  ;;  %p748_p6 = scmp.lt.s32.totalorder %s1123_s8, 15 }
  0x35   :  { %s91_s30 = sshra.s32 %s1322_s7, 3  ;;  %s80_s3 = scalar_lea.vmem [#allocation4], %s79_s0 }
  0x36   :  { %v81_v4 = vld [vmem:[%s80_s3] ss:$8 sm:$0x7]  ;;  %s94_s4 = sand.u32 7, %s1322_s7  ;;  %s746_s5 = smul.u32 24, %s91_s30 }
  0x37   :  { %83 = vst.msk [vmem:[#allocation7 + $0x2] ss:$8 sm:$0x7] %vm1139_vm0, %v81_v4  ;;  %s1324_s8 = smov (!%p105_p5, %s1123_s8), 0  ;;  %p123_p7 = scmp.gt.s32.totalorder %s1125_s9, 0 }
  0x38   :  { %s97_s15 = sadd.s32 %s746_s5, %s94_s4  ;;  %p755_p8 = scmp.lt.s32.totalorder %s1125_s9, 15 }
  0x39   :  { %s98_s6 = scalar_lea.vmem [#allocation4], %s97_s15  ;;  %s1326_s8 = smov (!%p748_p6, %s1324_s8), 15 }
  0x3a   :  { %v99_v5 = vld [vmem:[%s98_s6] ss:$8 sm:$0x7]  ;;  %s1328_s9 = smov (!%p123_p7, %s1125_s9), 0  ;;  %s109_s16 = sshra.s32 %s1326_s8, 3 }
  0x3b   :  { %101 = vst.msk [vmem:[#allocation7 + $0x3] ss:$8 sm:$0x7] %vm1139_vm0, %v99_v5  ;;  %s112_s7 = sand.u32 7, %s1326_s8  ;;  %s753_s17 = smul.u32 24, %s109_s16 }
  0x3c   :  { %p141_p9 = scmp.gt.s32.totalorder %s1127_s10, 0  ;;  %s1330_s9 = smov (!%p755_p8, %s1328_s9), 15 }
  0x3d   :  { %s115_s18 = sadd.s32 %s753_s17, %s112_s7  ;;  %p762_p10 = scmp.lt.s32.totalorder %s1127_s10, 15 }
  0x3e   :  { %s127_s19 = sshra.s32 %s1330_s9, 3  ;;  %s116_s20 = scalar_lea.vmem [#allocation4], %s115_s18 }
  0x3f   :  { %v117_v6 = vld [vmem:[%s116_s20] ss:$8 sm:$0x7]  ;;  %s130_s21 = sand.u32 7, %s1330_s9  ;;  %s760_s22 = smul.u32 24, %s127_s19 }
  0x40   :  { %119 = vst.msk [vmem:[#allocation7 + $0x4] ss:$8 sm:$0x7] %vm1139_vm0, %v117_v6  ;;  %s1332_s10 = smov (!%p141_p9, %s1127_s10), 0  ;;  %p159_p11 = scmp.gt.s32.totalorder %s1129_s11, 0 }
  0x41   :  { %s133_s23 = sadd.s32 %s760_s22, %s130_s21  ;;  %p769_p12 = scmp.lt.s32.totalorder %s1129_s11, 15 }
  0x42   :  { %s134_s8 = scalar_lea.vmem [#allocation4], %s133_s23  ;;  %s1334_s10 = smov (!%p762_p10, %s1332_s10), 15 }
  0x43   :  { %v135_v7 = vld [vmem:[%s134_s8] ss:$8 sm:$0x7]  ;;  %s1336_s11 = smov (!%p159_p11, %s1129_s11), 0  ;;  %s145_s24 = sshra.s32 %s1334_s10, 3 }
  0x44   :  { %137 = vst.msk [vmem:[#allocation7 + $0x5] ss:$8 sm:$0x7] %vm1139_vm0, %v135_v7  ;;  %s148_s9 = sand.u32 7, %s1334_s10  ;;  %s767_s25 = smul.u32 24, %s145_s24 }
  0x45   :  { %p177_p13 = scmp.gt.s32.totalorder %s1131_s12, 0  ;;  %s1338_s11 = smov (!%p769_p12, %s1336_s11), 15 }
  0x46   :  { %s151_s26 = sadd.s32 %s767_s25, %s148_s9  ;;  %p776_p0 = scmp.lt.s32.totalorder %s1131_s12, 15 }
  0x47   :  { %s163_s27 = sshra.s32 %s1338_s11, 3  ;;  %s152_s0 = scalar_lea.vmem [#allocation4], %s151_s26 }
  0x48   :  { %v153_v8 = vld [vmem:[%s152_s0] ss:$8 sm:$0x7]  ;;  %s166_s30 = sand.u32 7, %s1338_s11  ;;  %s774_s3 = smul.u32 24, %s163_s27 }
  0x49   :  { %155 = vst.msk [vmem:[#allocation7 + $0x6] ss:$8 sm:$0x7] %vm1139_vm0, %v153_v8  ;;  %s1340_s12 = smov (!%p177_p13, %s1131_s12), 0  ;;  %p195_p1 = scmp.gt.s32.totalorder %s1133_s13, 0 }
  0x4a   :  { %s169_s4 = sadd.s32 %s774_s3, %s166_s30  ;;  %p783_p2 = scmp.lt.s32.totalorder %s1133_s13, 15 }
  0x4b   :  { %s170_s10 = scalar_lea.vmem [#allocation4], %s169_s4  ;;  %s1342_s12 = smov (!%p776_p0, %s1340_s12), 15 }
  0x4c   :  { %v171_v9 = vld [vmem:[%s170_s10] ss:$8 sm:$0x7]  ;;  %s1344_s13 = smov (!%p195_p1, %s1133_s13), 0  ;;  %s181_s5 = sshra.s32 %s1342_s12, 3 }
  0x4d   :  { %173 = vst.msk [vmem:[#allocation7 + $0x7] ss:$8 sm:$0x7] %vm1139_vm0, %v171_v9  ;;  %s184_s11 = sand.u32 7, %s1342_s12  ;;  %s781_s15 = smul.u32 24, %s181_s5 }
  0x4e   :  { %p213_p3 = scmp.gt.s32.totalorder %s1135_s1, 0  ;;  %s1346_s13 = smov (!%p783_p2, %s1344_s13), 15 }
  0x4f   :  { %s187_s6 = sadd.s32 %s781_s15, %s184_s11  ;;  %p790_p4 = scmp.lt.s32.totalorder %s1135_s1, 15 }
  0x50   :  { %s199_s16 = sshra.s32 %s1346_s13, 3  ;;  %s188_s7 = scalar_lea.vmem [#allocation4], %s187_s6 }
  0x51   :  { %v189_v10 = vld [vmem:[%s188_s7] ss:$8 sm:$0x7]  ;;  %s202_s17 = sand.u32 7, %s1346_s13  ;;  %s788_s18 = smul.u32 24, %s199_s16 }
  0x52   :  { %191 = vst.msk [vmem:[#allocation7 + $0x18] ss:$8 sm:$0x7] %vm1139_vm0, %v189_v10  ;;  %s1348_s1 = smov (!%p213_p3, %s1135_s1), 0  ;;  %p231_p5 = scmp.gt.s32.totalorder %s1137_s14, 0 }
  0x53   :  { %s205_s19 = sadd.s32 %s788_s18, %s202_s17  ;;  %p797_p6 = scmp.lt.s32.totalorder %s1137_s14, 15 }
  0x54   :  { %s206_s20 = scalar_lea.vmem [#allocation4], %s205_s19  ;;  %s1350_s1 = smov (!%p790_p4, %s1348_s1), 15 }
  0x55   :  { %v207_v11 = vld [vmem:[%s206_s20] ss:$8 sm:$0x7]  ;;  %s1352_s14 = smov (!%p231_p5, %s1137_s14), 0  ;;  %s217_s12 = sshra.s32 %s1350_s1, 3 }
  0x56   :  { %209 = vst.msk [vmem:[#allocation7 + $0x19] ss:$8 sm:$0x7] %vm1139_vm0, %v207_v11  ;;  %s220_s21 = sand.u32 7, %s1350_s1  ;;  %s795_s22 = smul.u32 24, %s217_s12 }
  0x57   :  { %s803_s23 = sld [smem:[#allocation3 + $0xc]]  ;;  %s1354_s14 = smov (!%p797_p6, %s1352_s14), 15 }
  0x58   :  { %s223_s13 = sadd.s32 %s795_s22, %s220_s21  ;;  %s810_s8 = sld [smem:[#allocation3 + $0xd]] }
  0x59   :  { %s235_s24 = sshra.s32 %s1354_s14, 3  ;;  %s224_s9 = scalar_lea.vmem [#allocation4], %s223_s13 }
  0x5a   :  { %v225_v12 = vld [vmem:[%s224_s9] ss:$8 sm:$0x7]  ;;  %s238_s25 = sand.u32 7, %s1354_s14  ;;  %s802_s26 = smul.u32 24, %s235_s24 }
  0x5b   :  { %227 = vst.msk [vmem:[#allocation7 + $0x1a] ss:$8 sm:$0x7] %vm1139_vm0, %v225_v12  ;;  %s1195_s27 = sld [smem:[#allocation3 + $0xe]]  ;;  %s1197_s0 = sld [smem:[#allocation3 + $0xf]] }
  0x5c   :  { %s241_s30 = sadd.s32 %s802_s26, %s238_s25  ;;  %s831_s20 = sld [smem:[#allocation3 + $0x10]] }
  0x5d   :  { %p249_p7 = scmp.gt.s32.totalorder %s803_s23, 0  ;;  %p804_p8 = scmp.lt.s32.totalorder %s803_s23, 15 }
  0x5e   :  { %s242_s1 = scalar_lea.vmem [#allocation4], %s241_s30  ;;  %p267_p9 = scmp.gt.s32.totalorder %s810_s8, 0 }
  0x5f   :  { %v243_v13 = vld [vmem:[%s242_s1] ss:$8 sm:$0x7]  ;;  %s1356_s23 = smov (!%p249_p7, %s803_s23), 0  ;;  %p811_p10 = scmp.lt.s32.totalorder %s810_s8, 15 }
  0x60   :  { %245 = vst.msk [vmem:[#allocation7 + $0x1b] ss:$8 sm:$0x7] %vm1139_vm0, %v243_v13  ;;  %s1358_s23 = smov (!%p804_p8, %s1356_s23), 15  ;;  %s1360_s8 = smov (!%p267_p9, %s810_s8), 0 }
  0x61   :  { %s253_s14 = sshra.s32 %s1358_s23, 3  ;;  %s256_s3 = sand.u32 7, %s1358_s23 }
  0x62   :  { %s809_s4 = smul.u32 24, %s253_s14  ;;  %p285_p11 = scmp.gt.s32.totalorder %s1195_s27, 0 }
  0x63   :  { %s1362_s8 = smov (!%p811_p10, %s1360_s8), 15  ;;  %p818_p12 = scmp.lt.s32.totalorder %s1195_s27, 15 }
  0x64   :  { %s259_s10 = sadd.s32 %s809_s4, %s256_s3  ;;  %s271_s5 = sshra.s32 %s1362_s8, 3 }
  0x65   :  { %s260_s11 = scalar_lea.vmem [#allocation4], %s259_s10  ;;  %s274_s15 = sand.u32 7, %s1362_s8 }
  0x66   :  { %v261_v14 = vld [vmem:[%s260_s11] ss:$8 sm:$0x7]  ;;  %s816_s6 = smul.u32 24, %s271_s5  ;;  %s1364_s27 = smov (!%p285_p11, %s1195_s27), 0 }
  0x67   :  { %263 = vst.msk [vmem:[#allocation7 + $0x1c] ss:$8 sm:$0x7] %vm1139_vm0, %v261_v14  ;;  %p303_p13 = scmp.gt.s32.totalorder %s1197_s0, 0  ;;  %p825_p0 = scmp.lt.s32.totalorder %s1197_s0, 15 }
  0x68   :  { %s277_s16 = sadd.s32 %s816_s6, %s274_s15  ;;  %s1366_s27 = smov (!%p818_p12, %s1364_s27), 15 }
  0x69   :  { %s278_s7 = scalar_lea.vmem [#allocation4], %s277_s16  ;;  %s1368_s0 = smov (!%p303_p13, %s1197_s0), 0 }
  0x6a   :  { %v279_v15 = vld [vmem:[%s278_s7] ss:$8 sm:$0x7]  ;;  %s289_s17 = sshra.s32 %s1366_s27, 3  ;;  %s292_s18 = sand.u32 7, %s1366_s27 }
  0x6b   :  { %281 = vst.msk [vmem:[#allocation7 + $0x1d] ss:$8 sm:$0x7] %vm1139_vm0, %v279_v15  ;;  %s823_s19 = smul.u32 24, %s289_s17  ;;  %s1370_s0 = smov (!%p825_p0, %s1368_s0), 15 }
  0x6c   :  { %s838_s21 = sld [smem:[#allocation3 + $0x11]]  ;;  %s307_s22 = sshra.s32 %s1370_s0, 3 }
  0x6d   :  { %s295_s12 = sadd.s32 %s823_s19, %s292_s18  ;;  %s310_s13 = sand.u32 7, %s1370_s0 }
  0x6e   :  { %s296_s23 = scalar_lea.vmem [#allocation4], %s295_s12  ;;  %s830_s8 = smul.u32 24, %s307_s22 }
  0x6f   :  { %v297_v16 = vld [vmem:[%s296_s23] ss:$8 sm:$0x7]  ;;  %s1213_s24 = sld [smem:[#allocation3 + $0x12]]  ;;  %s1215_s9 = sld [smem:[#allocation3 + $0x13]] }
  0x70   :  { %299 = vst.msk [vmem:[#allocation7 + $0x1e] ss:$8 sm:$0x7] %vm1139_vm0, %v297_v16  ;;  %s313_s25 = sadd.s32 %s830_s8, %s310_s13  ;;  %p321_p1 = scmp.gt.s32.totalorder %s831_s20, 0 }
  0x71   :  { %p832_p2 = scmp.lt.s32.totalorder %s831_s20, 15  ;;  %s314_s26 = scalar_lea.vmem [#allocation4], %s313_s25 }
  0x72   :  { %v315_v17 = vld [vmem:[%s314_s26] ss:$8 sm:$0x7]  ;;  %s1372_s20 = smov (!%p321_p1, %s831_s20), 0  ;;  %p339_p3 = scmp.gt.s32.totalorder %s838_s21, 0 }
  0x73   :  { %317 = vst.msk [vmem:[#allocation7 + $0x1f] ss:$8 sm:$0x7] %vm1139_vm0, %v315_v17  ;;  %p839_p4 = scmp.lt.s32.totalorder %s838_s21, 15  ;;  %s1374_s20 = smov (!%p832_p2, %s1372_s20), 15 }
  0x74   :  { %s1376_s21 = smov (!%p339_p3, %s838_s21), 0  ;;  %s325_s27 = sshra.s32 %s1374_s20, 3 }
  0x75   :  { %s328_s0 = sand.u32 7, %s1374_s20  ;;  %s837_s30 = smul.u32 24, %s325_s27 }
  0x76   :  { %p357_p5 = scmp.gt.s32.totalorder %s1213_s24, 0  ;;  %s1378_s21 = smov (!%p839_p4, %s1376_s21), 15 }
  0x77   :  { %s331_s1 = sadd.s32 %s837_s30, %s328_s0  ;;  %p846_p6 = scmp.lt.s32.totalorder %s1213_s24, 15 }
  0x78   :  { %s343_s14 = sshra.s32 %s1378_s21, 3  ;;  %s332_s3 = scalar_lea.vmem [#allocation4], %s331_s1 }
  0x79   :  { %v333_v18 = vld [vmem:[%s332_s3] ss:$8 sm:$0x7]  ;;  %s346_s4 = sand.u32 7, %s1378_s21  ;;  %s844_s10 = smul.u32 24, %s343_s14 }
  0x7a   :  { %335 = vst.msk [vmem:[#allocation7 + $0x30] ss:$8 sm:$0x7] %vm1139_vm0, %v333_v18  ;;  %s1380_s24 = smov (!%p357_p5, %s1213_s24), 0  ;;  %p375_p7 = scmp.gt.s32.totalorder %s1215_s9, 0 }
  0x7b   :  { %s349_s5 = sadd.s32 %s844_s10, %s346_s4  ;;  %p853_p8 = scmp.lt.s32.totalorder %s1215_s9, 15 }
  0x7c   :  { %s350_s11 = scalar_lea.vmem [#allocation4], %s349_s5  ;;  %s1382_s24 = smov (!%p846_p6, %s1380_s24), 15 }
  0x7d   :  { %v351_v19 = vld [vmem:[%s350_s11] ss:$8 sm:$0x7]  ;;  %s1384_s9 = smov (!%p375_p7, %s1215_s9), 0  ;;  %s361_s15 = sshra.s32 %s1382_s24, 3 }
  0x7e   :  { %353 = vst.msk [vmem:[#allocation7 + $0x31] ss:$8 sm:$0x7] %vm1139_vm0, %v351_v19  ;;  %s364_s6 = sand.u32 7, %s1382_s24  ;;  %s851_s16 = smul.u32 24, %s361_s15 }
  0x7f   :  { %s859_s7 = sld [smem:[#allocation3 + $0x14]]  ;;  %s1386_s9 = smov (!%p853_p8, %s1384_s9), 15 }
  0x80   :  { %s367_s17 = sadd.s32 %s851_s16, %s364_s6  ;;  %s866_s18 = sld [smem:[#allocation3 + $0x15]] }
  0x81   :  { %s379_s19 = sshra.s32 %s1386_s9, 3  ;;  %s368_s20 = scalar_lea.vmem [#allocation4], %s367_s17 }
  0x82   :  { %v369_v20 = vld [vmem:[%s368_s20] ss:$8 sm:$0x7]  ;;  %s382_s12 = sand.u32 7, %s1386_s9  ;;  %s858_s21 = smul.u32 24, %s379_s19 }
  0x83   :  { %371 = vst.msk [vmem:[#allocation7 + $0x32] ss:$8 sm:$0x7] %vm1139_vm0, %v369_v20  ;;  %s1231_s22 = sld [smem:[#allocation3 + $0x16]]  ;;  %s1233_s23 = sld [smem:[#allocation3 + $0x17]] }
  0x84   :  { %s385_s13 = sadd.s32 %s858_s21, %s382_s12  ;;  %s887_s11 = sld [smem:[#allocation3 + $0x18]] }
  0x85   :  { %p393_p9 = scmp.gt.s32.totalorder %s859_s7, 0  ;;  %p860_p10 = scmp.lt.s32.totalorder %s859_s7, 15 }
  0x86   :  { %s386_s8 = scalar_lea.vmem [#allocation4], %s385_s13  ;;  %p411_p11 = scmp.gt.s32.totalorder %s866_s18, 0 }
  0x87   :  { %v387_v21 = vld [vmem:[%s386_s8] ss:$8 sm:$0x7]  ;;  %s1388_s7 = smov (!%p393_p9, %s859_s7), 0  ;;  %p867_p12 = scmp.lt.s32.totalorder %s866_s18, 15 }
  0x88   :  { %389 = vst.msk [vmem:[#allocation7 + $0x33] ss:$8 sm:$0x7] %vm1139_vm0, %v387_v21  ;;  %s1390_s7 = smov (!%p860_p10, %s1388_s7), 15  ;;  %s1392_s18 = smov (!%p411_p11, %s866_s18), 0 }
  0x89   :  { %s397_s24 = sshra.s32 %s1390_s7, 3  ;;  %s400_s9 = sand.u32 7, %s1390_s7 }
  0x8a   :  { %s865_s25 = smul.u32 24, %s397_s24  ;;  %p429_p13 = scmp.gt.s32.totalorder %s1231_s22, 0 }
  0x8b   :  { %s1394_s18 = smov (!%p867_p12, %s1392_s18), 15  ;;  %p874_p0 = scmp.lt.s32.totalorder %s1231_s22, 15 }
  0x8c   :  { %s403_s26 = sadd.s32 %s865_s25, %s400_s9  ;;  %s415_s27 = sshra.s32 %s1394_s18, 3 }
  0x8d   :  { %s404_s0 = scalar_lea.vmem [#allocation4], %s403_s26  ;;  %s418_s30 = sand.u32 7, %s1394_s18 }
  0x8e   :  { %v405_v22 = vld [vmem:[%s404_s0] ss:$8 sm:$0x7]  ;;  %s872_s1 = smul.u32 24, %s415_s27  ;;  %s1396_s22 = smov (!%p429_p13, %s1231_s22), 0 }
  0x8f   :  { %407 = vst.msk [vmem:[#allocation7 + $0x34] ss:$8 sm:$0x7] %vm1139_vm0, %v405_v22  ;;  %p447_p1 = scmp.gt.s32.totalorder %s1233_s23, 0  ;;  %p881_p2 = scmp.lt.s32.totalorder %s1233_s23, 15 }
  0x90   :  { %s421_s14 = sadd.s32 %s872_s1, %s418_s30  ;;  %s1398_s22 = smov (!%p874_p0, %s1396_s22), 15 }
  0x91   :  { %s422_s3 = scalar_lea.vmem [#allocation4], %s421_s14  ;;  %s1400_s23 = smov (!%p447_p1, %s1233_s23), 0 }
  0x92   :  { %v423_v23 = vld [vmem:[%s422_s3] ss:$8 sm:$0x7]  ;;  %s433_s4 = sshra.s32 %s1398_s22, 3  ;;  %s436_s10 = sand.u32 7, %s1398_s22 }
  0x93   :  { %425 = vst.msk [vmem:[#allocation7 + $0x35] ss:$8 sm:$0x7] %vm1139_vm0, %v423_v23  ;;  %s879_s5 = smul.u32 24, %s433_s4  ;;  %s1402_s23 = smov (!%p881_p2, %s1400_s23), 15 }
  0x94   :  { %s894_s6 = sld [smem:[#allocation3 + $0x19]]  ;;  %s451_s16 = sshra.s32 %s1402_s23, 3 }
  0x95   :  { %s439_s15 = sadd.s32 %s879_s5, %s436_s10  ;;  %s454_s17 = sand.u32 7, %s1402_s23 }
  0x96   :  { %s440_s7 = scalar_lea.vmem [#allocation4], %s439_s15  ;;  %s886_s18 = smul.u32 24, %s451_s16 }
  0x97   :  { %v441_v24 = vld [vmem:[%s440_s7] ss:$8 sm:$0x7]  ;;  %s1249_s19 = sld [smem:[#allocation3 + $0x1a]]  ;;  %s1251_s20 = sld [smem:[#allocation3 + $0x1b]] }
  0x98   :  { %443 = vst.msk [vmem:[#allocation7 + $0x36] ss:$8 sm:$0x7] %vm1139_vm0, %v441_v24  ;;  %s457_s12 = sadd.s32 %s886_s18, %s454_s17  ;;  %p465_p3 = scmp.gt.s32.totalorder %s887_s11, 0 }
  0x99   :  { %p888_p4 = scmp.lt.s32.totalorder %s887_s11, 15  ;;  %s458_s21 = scalar_lea.vmem [#allocation4], %s457_s12 }
  0x9a   :  { %v459_v25 = vld [vmem:[%s458_s21] ss:$8 sm:$0x7]  ;;  %s1404_s11 = smov (!%p465_p3, %s887_s11), 0  ;;  %p483_p5 = scmp.gt.s32.totalorder %s894_s6, 0 }
  0x9b   :  { %461 = vst.msk [vmem:[#allocation7 + $0x37] ss:$8 sm:$0x7] %vm1139_vm0, %v459_v25  ;;  %p895_p6 = scmp.lt.s32.totalorder %s894_s6, 15  ;;  %s1406_s11 = smov (!%p888_p4, %s1404_s11), 15 }
  0x9c   :  { %s1408_s6 = smov (!%p483_p5, %s894_s6), 0  ;;  %s469_s22 = sshra.s32 %s1406_s11, 3 }
  0x9d   :  { %s472_s23 = sand.u32 7, %s1406_s11  ;;  %s893_s13 = smul.u32 24, %s469_s22 }
  0x9e   :  { %p501_p7 = scmp.gt.s32.totalorder %s1249_s19, 0  ;;  %s1410_s6 = smov (!%p895_p6, %s1408_s6), 15 }
  0x9f   :  { %s475_s8 = sadd.s32 %s893_s13, %s472_s23  ;;  %p902_p8 = scmp.lt.s32.totalorder %s1249_s19, 15 }
  0xa0   :  { %s487_s24 = sshra.s32 %s1410_s6, 3  ;;  %s476_s9 = scalar_lea.vmem [#allocation4], %s475_s8 }
  0xa1   :  { %v477_v26 = vld [vmem:[%s476_s9] ss:$8 sm:$0x7]  ;;  %s490_s25 = sand.u32 7, %s1410_s6  ;;  %s900_s26 = smul.u32 24, %s487_s24 }
  0xa2   :  { %479 = vst.msk [vmem:[#allocation7 + $0x48] ss:$8 sm:$0x7] %vm1139_vm0, %v477_v26  ;;  %s1412_s19 = smov (!%p501_p7, %s1249_s19), 0  ;;  %p519_p9 = scmp.gt.s32.totalorder %s1251_s20, 0 }
  0xa3   :  { %s493_s27 = sadd.s32 %s900_s26, %s490_s25  ;;  %p909_p10 = scmp.lt.s32.totalorder %s1251_s20, 15 }
  0xa4   :  { %s494_s0 = scalar_lea.vmem [#allocation4], %s493_s27  ;;  %s1414_s19 = smov (!%p902_p8, %s1412_s19), 15 }
  0xa5   :  { %v495_v27 = vld [vmem:[%s494_s0] ss:$8 sm:$0x7]  ;;  %s1416_s20 = smov (!%p519_p9, %s1251_s20), 0  ;;  %s505_s30 = sshra.s32 %s1414_s19, 3 }
  0xa6   :  { %497 = vst.msk [vmem:[#allocation7 + $0x49] ss:$8 sm:$0x7] %vm1139_vm0, %v495_v27  ;;  %s508_s1 = sand.u32 7, %s1414_s19  ;;  %s907_s14 = smul.u32 24, %s505_s30 }
  0xa7   :  { %s915_s3 = sld [smem:[#allocation3 + $0x1c]]  ;;  %s1418_s20 = smov (!%p909_p10, %s1416_s20), 15 }
  0xa8   :  { %s511_s4 = sadd.s32 %s907_s14, %s508_s1  ;;  %s922_s10 = sld [smem:[#allocation3 + $0x1d]] }
  0xa9   :  { %s523_s5 = sshra.s32 %s1418_s20, 3  ;;  %s512_s11 = scalar_lea.vmem [#allocation4], %s511_s4 }
  0xaa   :  { %v513_v28 = vld [vmem:[%s512_s11] ss:$8 sm:$0x7]  ;;  %s526_s15 = sand.u32 7, %s1418_s20  ;;  %s914_s6 = smul.u32 24, %s523_s5 }
  0xab   :  { %515 = vst.msk [vmem:[#allocation7 + $0x4a] ss:$8 sm:$0x7] %vm1139_vm0, %v513_v28  ;;  %s1267_s16 = sld [smem:[#allocation3 + $0x1e]]  ;;  %s1269_s7 = sld [smem:[#allocation3 + $0x1f]] }
  0xac   :  { %s529_s17 = sadd.s32 %s914_s6, %s526_s15  ;;  %s1076_s30 = smov [#allocation7]  }
  0xad   :  { %p537_p11 = scmp.gt.s32.totalorder %s915_s3, 0  ;;  %p916_p12 = scmp.lt.s32.totalorder %s915_s3, 15 }
  0xae   :  { %s530_s18 = scalar_lea.vmem [#allocation4], %s529_s17  ;;  %p555_p13 = scmp.gt.s32.totalorder %s922_s10, 0 }
  0xaf   :  { %v531_v29 = vld [vmem:[%s530_s18] ss:$8 sm:$0x7]  ;;  %s1420_s3 = smov (!%p537_p11, %s915_s3), 0  ;;  %p923_p0 = scmp.lt.s32.totalorder %s922_s10, 15 }
  0xb0   :  { %533 = vst.msk [vmem:[#allocation7 + $0x4b] ss:$8 sm:$0x7] %vm1139_vm0, %v531_v29  ;;  %s1422_s3 = smov (!%p916_p12, %s1420_s3), 15  ;;  %s1424_s10 = smov (!%p555_p13, %s922_s10), 0 }
  0xb1   :  { %s541_s19 = sshra.s32 %s1422_s3, 3  ;;  %s544_s20 = sand.u32 7, %s1422_s3 }
  0xb2   :  { %s921_s12 = smul.u32 24, %s541_s19  ;;  %p573_p1 = scmp.gt.s32.totalorder %s1267_s16, 0 }
  0xb3   :  { %s1426_s10 = smov (!%p923_p0, %s1424_s10), 15  ;;  %p930_p2 = scmp.lt.s32.totalorder %s1267_s16, 15 }
  0xb4   :  { %s547_s21 = sadd.s32 %s921_s12, %s544_s20  ;;  %s559_s22 = sshra.s32 %s1426_s10, 3 }
  0xb5   :  { %s548_s23 = scalar_lea.vmem [#allocation4], %s547_s21  ;;  %s562_s13 = sand.u32 7, %s1426_s10 }
  0xb6   :  { %v549_v30 = vld [vmem:[%s548_s23] ss:$8 sm:$0x7]  ;;  %s928_s8 = smul.u32 24, %s559_s22  ;;  %s1428_s16 = smov (!%p573_p1, %s1267_s16), 0 }
  0xb7   :  { %551 = vst.msk [vmem:[#allocation7 + $0x4c] ss:$8 sm:$0x7] %vm1139_vm0, %v549_v30  ;;  %p591_p3 = scmp.gt.s32.totalorder %s1269_s7, 0  ;;  %p937_p4 = scmp.lt.s32.totalorder %s1269_s7, 15 }
  0xb8   :  { %s565_s24 = sadd.s32 %s928_s8, %s562_s13  ;;  %s1430_s16 = smov (!%p930_p2, %s1428_s16), 15 }
  0xb9   :  { %s566_s9 = scalar_lea.vmem [#allocation4], %s565_s24  ;;  %s1432_s7 = smov (!%p591_p3, %s1269_s7), 0 }
  0xba   :  { %v567_v31 = vld [vmem:[%s566_s9] ss:$8 sm:$0x7]  ;;  %s577_s25 = sshra.s32 %s1430_s16, 3  ;;  %s580_s26 = sand.u32 7, %s1430_s16 }
  0xbb   :  { %569 = vst.msk [vmem:[#allocation7 + $0x4d] ss:$8 sm:$0x7] %vm1139_vm0, %v567_v31  ;;  %s935_s27 = smul.u32 24, %s577_s25  ;;  %s1434_s7 = smov (!%p937_p4, %s1432_s7), 15 }
  0xbc   :  { %s612_s1 = sshll.u32 %s1076_s30, 4  ;;  %s595_s14 = sshra.s32 %s1434_s7, 3  ;;  %s613_s1 = int_to_ptr.vmem [resolvable:$true] %s612_s1 }
  0xbd   :  { %s583_s0 = sadd.s32 %s935_s27, %s580_s26  ;;  %s598_s4 = sand.u32 7, %s1434_s7 }
  0xbe   :  { %s584_s3 = scalar_lea.vmem [#allocation4], %s583_s0  ;;  %s942_s10 = smul.u32 24, %s595_s14 }
  0xbf   :  { %v585_v32 = vld [vmem:[%s584_s3] ss:$8 sm:$0x7]  ;;  %s1044_s15 = scalar_lea.vmem %s613_s1, 1536  ;;  %p1049_p6 = scmp.lt.s32.totalorder %s613_s1, %s613_s1 }
  0xc0   :  { %587 = vst.msk [vmem:[#allocation7 + $0x4e] ss:$8 sm:$0x7] %vm1139_vm0, %v585_v32  ;;  %s601_s5 = sadd.s32 %s942_s10, %s598_s4  ;;  %p1045_p5 = scmp.ne.s32.totalorder %s613_s1, %s1044_s15 }
  0xc1   :  { %s602_s11 = scalar_lea.vmem [#allocation4], %s601_s5  ;;  %p1050_p7 = scmp.lt.s32.totalorder %s1044_s15, %s1044_s15 }
  0xc2   :  { %v603_v33 = vld [vmem:[%s602_s11] ss:$8 sm:$0x7] }
  0xc3   :  { %605 = vst.msk [vmem:[#allocation7 + $0x4f] ss:$8 sm:$0x7] %vm1139_vm0, %v603_v33  ;;  %p1051_p8 = por %p1050_p7, %p1049_p6 }
  0xc5   :  { %p1052_p9 = pnand %p1051_p8, %p1045_p5 }
  0xc7   :  { %1055 = shalt.err (!%p1052_p9)
}
  0xc8   :  { %s1056_s7 = scalar_lea.hbm %s1304_s2, 1536 }
  0xc9   :  { %p1057_p10 = scmp.ne.s32.totalorder %s1304_s2, %s1056_s7  ;;  %p1060_p11 = scmp.lt.u32.totalorder %s1056_s7, %s1304_s2 }
  0xcb   :  { %p1062_p12 = pnand %p1060_p11, %p1057_p10 }
  0xcd   :  { %1065 = shalt.err (!%p1062_p12)
}
  0xce   :  { %618 = dma.vmem_to_hbm [thread:$0]  %s613_s1, 1536, %s1304_s2, [#allocation6], %s1074_s28, %s1074_s28, %s1075_s29  }
  0xcf   :  { %1070 = dma.done.wait [#allocation6], 1536  }
  0xd0   :  { %1071 = vsyncadd [#allocation6], 4294965760 }
  0xd1   :  { %622 = vsyncpa [#allocation5], 1 }
  0xd2   :  { %623 = vsyncpa [#allocation6], 1 }

</bundles_post_ra>
